<compile_context>
chip_gen: v6e
topology: v6e:2x2x1
jax: 0.10.0
libtpu: 0.0.40
codegen_flags: <defaults>
</compile_context>

<pallas_src>
import math
import functools

import jax
import jax.numpy as jnp
from jax.experimental import pallas as pl
from jax.experimental.pallas import tpu as pltpu


# ---------------------------------------------------------------------------
# Kernels (elementwise; pe block broadcasts over the batch block dim 0)
# ---------------------------------------------------------------------------
def pe_add_kernel(x_ref, pe_ref, o_ref):
    # eval-mode forward: x + pe   (dropout is identity in eval)
    o_ref[...] = x_ref[...] + pe_ref[...]


def pe_add_dropout_kernel(x_ref, pe_ref, u_ref, o_ref, *, p):
    # training-mode forward: dropout(x + pe, p)
    y = x_ref[...] + pe_ref[...]
    keep = u_ref[...] >= jnp.float32(p)          # keep with prob (1 - p)
    scale = jnp.asarray(1.0 / (1.0 - p), dtype=y.dtype)
    o_ref[...] = jnp.where(keep, y * scale, jnp.zeros_like(y))


# ---------------------------------------------------------------------------
# Parameter (buffer) setup — deterministic, mirrors the PyTorch __init__
# Pre-cast the table to the model dtype once here (not per call).
# ---------------------------------------------------------------------------
def make_positional_encoding_table(d_model, max_len=5000, dtype=jnp.float32):
    position = jnp.arange(max_len, dtype=jnp.float32)[:, None]            # (max_len, 1)
    div_term = jnp.exp(
        jnp.arange(0, d_model, 2, dtype=jnp.float32) * (-math.log(10000.0) / d_model)
    )                                                                      # (d_model//2,)
    angles = position * div_term                                           # (max_len, d_model//2)
    pe = jnp.zeros((max_len, d_model), dtype=jnp.float32)
    pe = pe.at[:, 0::2].set(jnp.sin(angles))
    pe = pe.at[:, 1::2].set(jnp.cos(angles))
    return pe[None].astype(dtype)                                          # (1, max_len, d_model)


# ---------------------------------------------------------------------------
# Tiling / layout selection
# ---------------------------------------------------------------------------
_VMEM_BUDGET = 12 * 1024 * 1024   # target bytes for all double-buffered blocks
_VMEM_LIMIT = 32 * 1024 * 1024    # fits v5e/v6e/v7x scoped VMEM


def _build_layout(x, pe, training):
    """Returns (grid, in_specs, out_specs, x_in, pe_in, u_shape, out_shape)."""
    B, S, D = x.shape
    max_len = pe.shape[1]
    itemsize = jnp.dtype(x.dtype).itemsize
    n_ops = 4 if training else 3              # x, pe, out (+ u in training)
    flat = S * D

    if flat % 128 == 0:
        # Lane-dense flattened layout: arrays become (B, S*D) / (1, max_len*D).
        Bt = B if B <= 8 else 8
        rows_per_col = (n_ops - 1) * Bt + 1   # x/out/(u) carry Bt rows; pe carries 1
        bytes_per_col = 2 * rows_per_col * itemsize   # x2 for double buffering
        T = _VMEM_BUDGET // bytes_per_col
        if T >= flat:
            T = flat
        else:
            T = max(128, (T // 128) * 128)

        grid = (pl.cdiv(flat, T), pl.cdiv(B, Bt))     # t outer, b inner -> pe tile stays resident
        x_spec = pl.BlockSpec((Bt, T), lambda t, b: (b, t))
        pe_spec = pl.BlockSpec((1, T), lambda t, b: (0, t))
        u_spec = pl.BlockSpec((Bt, T), lambda t, b: (b, t))
        out_spec = pl.BlockSpec((Bt, T), lambda t, b: (b, t))

        x_in = x.reshape(B, flat)                      # metadata-only reshape
        pe_in = pe.reshape(1, max_len * D)             # metadata-only reshape
        u_shape = (B, flat)
        out_shape = jax.ShapeDtypeStruct((B, flat), x.dtype)
    else:
        # Fallback: sequence-tiled 3D layout (1, TS, D), TS multiple of 8.
        bytes_per_row = 2 * n_ops * D * itemsize
        TS = _VMEM_BUDGET // bytes_per_row
        if TS >= S:
            TS = S
        else:
            TS = max(8, (TS // 8) * 8)

        grid = (pl.cdiv(S, TS), B)                     # s outer, b inner
        x_spec = pl.BlockSpec((1, TS, D), lambda s, b: (b, s, 0))
        pe_spec = pl.BlockSpec((1, TS, D), lambda s, b: (0, s, 0))
        u_spec = pl.BlockSpec((1, TS, D), lambda s, b: (b, s, 0))
        out_spec = pl.BlockSpec((1, TS, D), lambda s, b: (b, s, 0))

        x_in = x
        pe_in = pe
        u_shape = (B, S, D)
        out_shape = jax.ShapeDtypeStruct((B, S, D), x.dtype)

    return grid, (x_spec, pe_spec, u_spec), out_spec, x_in, pe_in, u_shape, out_shape


# ---------------------------------------------------------------------------
# Forward wrapper
# ---------------------------------------------------------------------------
def positional_encoding_forward(x, pe, *, p=0.1, training=False, rng=None):
    """x: [B, S, D], pe: [1, max_len, D] -> [B, S, D].

    `rng` (a jax PRNG key) must be supplied and varied per training step when
    training=True, otherwise the same dropout mask is reproduced every call.
    """
    B, S, D = x.shape
    if pe.dtype != x.dtype:
        pe = pe.astype(x.dtype)   # prefer pre-casting at init; this is a fallback

    grid, (x_spec, pe_spec, u_spec), out_spec, x_in, pe_in, u_shape, out_shape = \
        _build_layout(x, pe, training and p > 0.0)

    cp = pltpu.CompilerParams(
        dimension_semantics=("parallel", "parallel"),
        vmem_limit_bytes=_VMEM_LIMIT,
    )

    if (not training) or p == 0.0:
        y = pl.pallas_call(
            pe_add_kernel,
            out_shape=out_shape,
            grid=grid,
            in_specs=[x_spec, pe_spec],
            out_specs=out_spec,
            compiler_params=cp,
        )(x_in, pe_in)
    else:
        if rng is None:
            rng = jax.random.PRNGKey(0)
        # Draw in (B, S, D) order so the mask is layout-independent, then view
        # in the kernel layout (free reshape).
        u = jax.random.uniform(rng, (B, S, D), dtype=jnp.float32).reshape(u_shape)
        kernel = functools.partial(pe_add_dropout_kernel, p=float(p))
        y = pl.pallas_call(
            kernel,
            out_shape=out_shape,
            grid=grid,
            in_specs=[x_spec, pe_spec, u_spec],
            out_specs=out_spec,
            compiler_params=cp,
        )(x_in, pe_in, u)

    return y.reshape(B, S, D)


# ---------------------------------------------------------------------------
# Main
# ---------------------------------------------------------------------------
if __name__ == "__main__":
    B, S, D = 2, 8, 32       # batch, seq, d_model
    MAX_LEN = 5000
    P_DROP = 0.1

    key = jax.random.PRNGKey(0)
    key_x, key_drop = jax.random.split(key)
    x = jax.random.normal(key_x, (B, S, D), dtype=jnp.float32)

    pe = make_positional_encoding_table(D, max_len=MAX_LEN, dtype=jnp.float32)
    y_ref = x + pe[:, :S, :]

    # Eval-mode forward (dropout == identity): check against plain-JAX reference.
    y_eval = jax.block_until_ready(
        positional_encoding_forward(x, pe, p=P_DROP, training=False)
    )
    assert y_eval.shape == (B, S, D)
    assert jnp.allclose(y_eval, y_ref, atol=1e-6, rtol=1e-6), "eval forward mismatch"

    # Training-mode forward: exact check (same PRNG key reproduces the mask).
    y_train = jax.block_until_ready(
        positional_encoding_forward(x, pe, p=P_DROP, training=True, rng=key_drop)
    )
    assert y_train.shape == (B, S, D)
    u_ref = jax.random.uniform(key_drop, (B, S, D), dtype=jnp.float32)
    y_train_ref = jnp.where(u_ref >= P_DROP, y_ref / (1.0 - P_DROP), 0.0)
    assert jnp.allclose(y_train, y_train_ref, atol=1e-5, rtol=1e-5), \
        "training forward (dropout) mismatch"

    print("KERNEL_OK")
</pallas_src>

<mosaic_0001>
module attributes {stable_mosaic.version = 11 : i64} {
  func.func @pe_add_kernel(%arg0: i32, %arg1: i32, %arg2: memref<2x256xf32, #tpu.memory_space<vmem>>, %arg3: memref<1x256xf32, #tpu.memory_space<vmem>>, %arg4: memref<2x256xf32, #tpu.memory_space<vmem>>) attributes {dimension_semantics = [#tpu.dimension_semantics<parallel>, #tpu.dimension_semantics<parallel>], iteration_bounds = array<i64: 1, 1>, scalar_prefetch = 0 : i64, scratch_operands = 0 : i64, tpu.core_type = #tpu.core_type<tc>, window_params = [{transform_indices = @transform_0, window_bounds = array<i64: 2, 256>}, {transform_indices = @transform_1, window_bounds = array<i64: 1, 256>}, {transform_indices = @transform_2, window_bounds = array<i64: 2, 256>}]} {
    %c0 = arith.constant 0 : index
    %c0_0 = arith.constant 0 : index
    %0 = vector.load %arg2[%c0, %c0_0] : memref<2x256xf32, #tpu.memory_space<vmem>>, vector<2x256xf32>
    %c0_1 = arith.constant 0 : index
    %c0_2 = arith.constant 0 : index
    %1 = vector.load %arg3[%c0_1, %c0_2] : memref<1x256xf32, #tpu.memory_space<vmem>>, vector<1x256xf32>
    %2 = vector.broadcast %1 : vector<1x256xf32> to vector<2x256xf32>
    %3 = arith.addf %0, %2 : vector<2x256xf32>
    %c0_3 = arith.constant 0 : index
    %c0_4 = arith.constant 0 : index
    %4 = vector.load %arg4[%c0_3, %c0_4] : memref<2x256xf32, #tpu.memory_space<vmem>>, vector<2x256xf32>
    tpu.vector_store %arg4[%c0_3, %c0_4], %3 {strides = array<i32>} : memref<2x256xf32, #tpu.memory_space<vmem>>, vector<2x256xf32>,
    return
  }
  func.func @transform_0(%arg0: i32, %arg1: i32) -> (i32, i32) {
    %c0_i32 = arith.constant 0 : i32
    return %arg1, %arg0 : i32, i32
  }
  func.func @transform_1(%arg0: i32, %arg1: i32) -> (i32, i32) {
    %c0_i32 = arith.constant 0 : i32
    %c0_i32_0 = arith.constant 0 : i32
    return %c0_i32, %arg0 : i32, i32
  }
  func.func @transform_2(%arg0: i32, %arg1: i32) -> (i32, i32) {
    %c0_i32 = arith.constant 0 : i32
    return %arg1, %arg0 : i32, i32
  }
}

</mosaic_0001>

<bundles_post_ra>
// kernel: tpu_custom_call.1
= control target key start
LH: loop header
LB: loop body
LE: loop exit
PB: predicated region body
PF: predicated region fallthrough
CT: control target
= control target key end

     0   :  { %7 = vsyncpa [#allocation3], 0  ;;  %s172_s0 = inlined_call_operand.hbm [shape: f32[2,256], index: 0, kind: input, shape index: {}]   ;;  %s173_s1 = inlined_call_operand.hbm [shape: f32[1,160000], index: 1, kind: input, shape index: {}]   ;;  %s174_s2 = inlined_call_operand.hbm [shape: f32[2,256], index: 2, kind: output, shape index: {}]  }
   0x1   :  { %8 = vsyncpa [#allocation6], 0 }
   0x2   :  { %9 = vsyncpa [#allocation4], 0  ;;  %s144_s9 = smov [#allocation2]   ;;  %s145_s11 = smov [#allocation5]  }
   0x3   :  { %s16_s10 = sshll.u32 %s144_s9, 4  ;;  %s26_s12 = sshll.u32 %s145_s11, 4  ;;  %s17_s10 = int_to_ptr.vmem [resolvable:$true] %s16_s10  ;;  %s27_s12 = int_to_ptr.vmem [resolvable:$true] %s26_s12 }
   0x4   :  { %s86_s13 = scalar_lea.vmem %s17_s10, 64  ;;  %p91_p1 = scmp.lt.s32.totalorder %s17_s10, %s17_s10 }
   0x5   :  { %p87_p0 = scmp.ne.s32.totalorder %s17_s10, %s86_s13  ;;  %p92_p2 = scmp.lt.s32.totalorder %s86_s13, %s86_s13 }
   0x7   :  { %p93_p3 = por %p92_p2, %p91_p1 }
   0x9   :  { %p94_p4 = pnand %p93_p3, %p87_p0 }
   0xb   :  { %97 = shalt.err (!%p94_p4)
}
   0xc   :  { %19 = dma.hbm_to_vmem [thread:$0]  %s172_s0, 64, %s17_s10, [#allocation3]  }
   0xd   :  { %s106_s16 = scalar_lea.vmem %s27_s12, 32  ;;  %p111_p6 = scmp.lt.s32.totalorder %s27_s12, %s27_s12 }
   0xe   :  { %p107_p5 = scmp.ne.s32.totalorder %s27_s12, %s106_s16  ;;  %p112_p7 = scmp.lt.s32.totalorder %s106_s16, %s106_s16 }
  0x10   :  { %p113_p8 = por %p112_p7, %p111_p6 }
  0x12   :  { %p114_p9 = pnand %p113_p8, %p107_p5 }
  0x14   :  { %117 = shalt.err (!%p114_p9)
}
  0x15   :  { %29 = dma.hbm_to_vmem [thread:$0]  %s173_s1, 32, %s27_s12, [#allocation6]  }
  0x16   :  { %138 = dma.done.wait [#allocation3], 64  }
  0x17   :  { %139 = vsyncadd [#allocation3], 4294967232 }
  0x18   :  { %140 = dma.done.wait [#allocation6], 32  }
  0x19   :  { %141 = vsyncadd [#allocation6], 4294967264  ;;  %v39_v0 = vlaneseq  ;;  %v146_v1 = vmov 1983009808   ;;  %v37_v7 = vld [vmem:[#allocation5] sm:$0x3] }
  0x1a   :  { %v49_v2 = vunpack.c.l.s4 %v146_v1  ;;  %v36_v12 = vld [vmem:[#allocation2] sm:$0xf]  ;;  %s147_s0 = smov [#allocation7]  }
  0x1b   :  { %v40_v3 = vshrl.u32 %v39_v0, 7  ;;  %s64_s19 = sshll.u32 %s147_s0, 4  ;;  %s65_s19 = int_to_ptr.vmem [resolvable:$true] %s64_s19 }
  0x1c   :  { %v50_v6 = vunpack.c.0.s8 %v49_v2  ;;  %s118_s1 = scalar_lea.vmem %s65_s19, 64  ;;  %p123_p11 = scmp.lt.s32.totalorder %s65_s19, %s65_s19 }
  0x1d   :  { %v41_v4 = vsub.s32 0, %v40_v3  ;;  %v45_v5 = vsub.s32 1, %v40_v3  ;;  %p119_p10 = scmp.ne.s32.totalorder %s65_s19, %s118_s1  ;;  %p124_p12 = scmp.lt.s32.totalorder %s118_s1, %s118_s1 }
  0x1e   :  { %v53_v10 = vsub.s32 %v50_v6, %v40_v3 }
  0x1f   :  { %v42_v8 = vrot.slane %v37_v7, %v41_v4  ;;  %v46_v9 = vrot.slane %v37_v7, %v45_v5  ;;  %p125_p13 = por %p124_p12, %p123_p11 }
  0x21   :  { %v47_v11 = vcombine.low %v42_v8, %v46_v9  ;;  %p126_p0 = pnand %p125_p13, %p119_p10 }
  0x23   :  { %v54_v13 = vrot.slane %v47_v11, %v53_v10 }
  0x25   :  { %v56_v14 = vadd.f32 %v54_v13, %v36_v12 }
  0x27   :  { %57 = vst [vmem:[#allocation7] sm:$0xf] %v56_v14 }
  0x28   :  { %129 = shalt.err (!%p126_p0)
}
  0x29   :  { %67 = dma.vmem_to_hbm [thread:$0]  %s65_s19, 64, %s174_s2, [#allocation4]  }
  0x2a   :  { %142 = dma.done.wait [#allocation4], 64  }
  0x2b   :  { %143 = vsyncadd [#allocation4], 4294967232 }
  0x2c   :  { %71 = vsyncpa [#allocation3], 1 }
  0x2d   :  { %72 = vsyncpa [#allocation6], 1 }
  0x2e   :  { %73 = vsyncpa [#allocation4], 1 }

</bundles_post_ra>
